<compile_context>
chip_gen: v7x
topology: tpu7x:2x2x1
jax: 0.10.0
libtpu: 0.0.40
codegen_flags: <defaults>
</compile_context>

<pallas_src>
import jax
import jax.numpy as jnp
from jax.experimental import pallas as pl
from jax.experimental.pallas import tpu as pltpu


def _round_up(x, m):
    return ((x + m - 1) // m) * m


# ----------------------------------------------------------------------------
# Kernels
# ----------------------------------------------------------------------------
def _linear_kernel_single_k(x_ref, w_ref, b_ref, o_ref):
    """Whole reduction in one tile: y = x @ w + b, no accumulator machinery."""
    o_ref[...] = (
        b_ref[...]
        + jnp.dot(x_ref[...], w_ref[...], preferred_element_type=jnp.float32)
    ).astype(o_ref.dtype)


def _linear_kernel_acc_out(x_ref, w_ref, b_ref, o_ref):
    """Multi-K, f32 output: accumulate directly in the resident output tile.

    Bias is folded into the k == 0 init, so there is no finalize pass.
    """
    k = pl.program_id(2)

    @pl.when(k == 0)
    def _init():
        o_ref[...] = jnp.broadcast_to(b_ref[...], o_ref.shape)

    o_ref[...] += jnp.dot(x_ref[...], w_ref[...],
                          preferred_element_type=jnp.float32)


def _linear_kernel_acc_scratch(x_ref, w_ref, b_ref, o_ref, acc_ref):
    """Multi-K, narrow output dtype: f32 scratch accumulator, cast once."""
    k = pl.program_id(2)

    @pl.when(k == 0)
    def _init():
        acc_ref[...] = jnp.broadcast_to(b_ref[...], acc_ref.shape)

    acc_ref[...] += jnp.dot(x_ref[...], w_ref[...],
                            preferred_element_type=jnp.float32)

    @pl.when(k == pl.num_programs(2) - 1)
    def _fin():
        o_ref[...] = acc_ref[...].astype(o_ref.dtype)


# ----------------------------------------------------------------------------
# Wrapper
# ----------------------------------------------------------------------------
def linear_forward(x, weight, bias, *, tm=512, tn=512, tk=512,
                   compute_dtype=None):
    """y = x @ weight.T + bias  (matches torch.nn.Linear semantics).

    x:       (B, input_dim)
    weight:  (output_dim, input_dim)   -- PyTorch layout
    bias:    (output_dim,)
    compute_dtype: optional MXU input dtype (e.g. jnp.bfloat16).  Accumulation
        is always f32; the output keeps x.dtype.
    """
    B, d_in = x.shape
    d_out, d_in_w = weight.shape
    assert d_in == d_in_w
    assert bias.shape == (d_out,)

    out_dtype = x.dtype
    cdt = jnp.dtype(compute_dtype) if compute_dtype is not None else jnp.dtype(x.dtype)

    # --- sanitize caller-supplied tile targets (8 / 128 legality) ------------
    tm = max(8, (int(tm) // 8) * 8)
    tn = max(128, (int(tn) // 128) * 128)
    tk = max(128, (int(tk) // 128) * 128)

    # Full-extent blocks are always legal; otherwise use the aligned target.
    TM = B if B <= tm else tm
    TN = d_out if d_out <= tn else tn
    TK = d_in if d_in <= tk else tk

    gm = pl.cdiv(B, TM)
    gn = pl.cdiv(d_out, TN)

    # v7x megacore: if the whole problem is one block, split M so both
    # TensorCores get work (no-op cost on single-TC parts).
    if gm == 1 and gn == 1 and B >= 16:
        TM = _round_up(pl.cdiv(B, 2), 8)
        gm = pl.cdiv(B, TM)

    # K must be zero-padded (padded columns contribute 0); M / N raggedness is
    # handled by Pallas' masked boundary blocks, so x is NOT copied for them.
    K_pad = _round_up(d_in, TK)
    gk = K_pad // TK

    x_c = jnp.asarray(x, cdt)
    wt = jnp.asarray(weight, cdt).T            # (d_in, d_out), one-time XLA transpose
    if K_pad != d_in:
        x_c = jnp.pad(x_c, ((0, 0), (0, K_pad - d_in)))
        wt = jnp.pad(wt, ((0, K_pad - d_in), (0, 0)))
    b2 = jnp.asarray(bias, jnp.float32).reshape(1, d_out)

    # --- VMEM budget: double-buffered tiles (+ f32 scratch if used) ----------
    bx = jnp.dtype(cdt).itemsize
    bo = jnp.dtype(out_dtype).itemsize
    need = 2 * (TM * TK * bx + TK * TN * bx + 8 * TN * 4 + TM * TN * bo)
    use_scratch = (gk > 1) and (jnp.dtype(out_dtype) != jnp.dtype(jnp.float32))
    if use_scratch:
        need += TM * TN * 4
    try:
        phys = int(pltpu.get_tpu_info().vmem_capacity_bytes)
    except Exception:
        phys = 64 * 1024 * 1024                 # conservative (v7x per-TC)
    vmem_limit = int(min(max(need + need // 2, 8 * 1024 * 1024),
                         (phys * 3) // 4))

    # --- grid / specs ---------------------------------------------------------
    if gk == 1:
        kernel = _linear_kernel_single_k
        grid = (gm, gn)
        in_specs = [
            pl.BlockSpec((TM, TK), lambda i, j: (i, 0)),   # x tile
            pl.BlockSpec((TK, TN), lambda i, j: (0, j)),   # weight^T tile
            pl.BlockSpec((1, TN), lambda i, j: (0, j)),    # bias tile
        ]
        out_specs = pl.BlockSpec((TM, TN), lambda i, j: (i, j))
        scratch = []
        dims = ("parallel", "parallel")
    else:
        grid = (gm, gn, gk)
        in_specs = [
            pl.BlockSpec((TM, TK), lambda i, j, k: (i, k)),
            pl.BlockSpec((TK, TN), lambda i, j, k: (k, j)),
            pl.BlockSpec((1, TN), lambda i, j, k: (0, j)),
        ]
        out_specs = pl.BlockSpec((TM, TN), lambda i, j, k: (i, j))
        dims = ("parallel", "parallel", "arbitrary")
        if use_scratch:
            kernel = _linear_kernel_acc_scratch
            scratch = [pltpu.VMEM((TM, TN), jnp.float32)]
        else:
            kernel = _linear_kernel_acc_out
            scratch = []

    return pl.pallas_call(
        kernel,
        out_shape=jax.ShapeDtypeStruct((B, d_out), out_dtype),
        grid=grid,
        in_specs=in_specs,
        out_specs=out_specs,
        scratch_shapes=scratch,
        compiler_params=pltpu.CompilerParams(
            dimension_semantics=dims,
            vmem_limit_bytes=vmem_limit),
    )(x_c, wt, b2)


# ----------------------------------------------------------------------------
# Self test
# ----------------------------------------------------------------------------
def _check(batch, input_dim, output_dim, key, *, tol=1e-3, **kw):
    kx, kw_, kb = jax.random.split(key, 3)
    x = jax.random.normal(kx, (batch, input_dim), dtype=jnp.float32)
    bound = 1.0 / (input_dim ** 0.5)
    weight = jax.random.uniform(kw_, (output_dim, input_dim),
                                minval=-bound, maxval=bound, dtype=jnp.float32)
    bias = jax.random.uniform(kb, (output_dim,),
                              minval=-bound, maxval=bound, dtype=jnp.float32)

    y = jax.block_until_ready(linear_forward(x, weight, bias, **kw))

    cdt = kw.get("compute_dtype", None)
    if cdt is not None and jnp.dtype(cdt) != jnp.dtype(jnp.float32):
        xr = x.astype(cdt).astype(jnp.float32)
        wr = weight.astype(cdt).astype(jnp.float32)
    else:
        xr, wr = x, weight
    y_ref = xr @ wr.T + bias

    assert y.shape == (batch, output_dim), f"bad shape {y.shape}"
    assert y.dtype == x.dtype, f"bad dtype {y.dtype}"
    assert jnp.allclose(y, y_ref, atol=tol, rtol=tol), (
        f"mismatch at ({batch},{input_dim})->({output_dim}) kwargs={kw}")


if __name__ == "__main__":
    key = jax.random.PRNGKey(0)
    k1, k2, k3, k4 = jax.random.split(key, 4)

    # Toy shape consistent with nn.Linear(input_dim=32, output_dim=16).
    _check(batch=8, input_dim=32, output_dim=16, key=k1)

    # Larger, non-128-aligned shape: single-K fast path + M-split for megacore.
    _check(batch=200, input_dim=384, output_dim=192, key=k2)

    # Same shape on the bf16 MXU path (f32 accumulation, f32 output).
    _check(batch=200, input_dim=384, output_dim=192, key=k3,
           compute_dtype=jnp.bfloat16, tol=2e-3)

    # Small tiles to exercise the multi-K accumulate-in-output path,
    # ragged M/N boundary blocks and K zero-padding.
    _check(batch=100, input_dim=300, output_dim=200, key=k4,
           tm=64, tn=128, tk=128)

    print("KERNEL_OK")
</pallas_src>

<mosaic_0001>
module attributes {stable_mosaic.version = 11 : i64} {
  func.func @_linear_kernel_single_k(%arg0: i32, %arg1: i32, %arg2: memref<8x32xf32, #tpu.memory_space<vmem>>, %arg3: memref<32x16xf32, #tpu.memory_space<vmem>>, %arg4: memref<1x16xf32, #tpu.memory_space<vmem>>, %arg5: memref<8x16xf32, #tpu.memory_space<vmem>>) attributes {dimension_semantics = [#tpu.dimension_semantics<parallel>, #tpu.dimension_semantics<parallel>], iteration_bounds = array<i64: 1, 1>, scalar_prefetch = 0 : i64, scratch_operands = 0 : i64, tpu.core_type = #tpu.core_type<tc>, window_params = [{transform_indices = @transform_0, window_bounds = array<i64: 8, 32>}, {transform_indices = @transform_1, window_bounds = array<i64: 32, 16>}, {transform_indices = @transform_2, window_bounds = array<i64: 1, 16>}, {transform_indices = @transform_3, window_bounds = array<i64: 8, 16>}]} {
    %c0 = arith.constant 0 : index
    %c0_0 = arith.constant 0 : index
    %0 = vector.load %arg4[%c0, %c0_0] : memref<1x16xf32, #tpu.memory_space<vmem>>, vector<1x16xf32>
    %c0_1 = arith.constant 0 : index
    %c0_2 = arith.constant 0 : index
    %1 = vector.load %arg2[%c0_1, %c0_2] : memref<8x32xf32, #tpu.memory_space<vmem>>, vector<8x32xf32>
    %c0_3 = arith.constant 0 : index
    %c0_4 = arith.constant 0 : index
    %2 = vector.load %arg3[%c0_3, %c0_4] : memref<32x16xf32, #tpu.memory_space<vmem>>, vector<32x16xf32>
    %cst = arith.constant dense<0.000000e+00> : vector<8x16xf32>
    %3 = tpu.matmul %1, %2, %cst {dimension_numbers = #tpu.dot_dimension_numbers<[1], [0], [0], [1], [0, 0, 1, 1], [], []>} : vector<8x32xf32>, vector<32x16xf32>, vector<8x16xf32> -> vector<8x16xf32>
    %4 = vector.broadcast %0 : vector<1x16xf32> to vector<8x16xf32>
    %5 = arith.addf %4, %3 : vector<8x16xf32>
    %c0_5 = arith.constant 0 : index
    %c0_6 = arith.constant 0 : index
    %6 = vector.load %arg5[%c0_5, %c0_6] : memref<8x16xf32, #tpu.memory_space<vmem>>, vector<8x16xf32>
    tpu.vector_store %arg5[%c0_5, %c0_6], %5 {strides = array<i32>} : memref<8x16xf32, #tpu.memory_space<vmem>>, vector<8x16xf32>,
    return
  }
  func.func @transform_0(%arg0: i32, %arg1: i32) -> (i32, i32) {
    %c0_i32 = arith.constant 0 : i32
    %c0_i32_0 = arith.constant 0 : i32
    return %arg0, %c0_i32 : i32, i32
  }
  func.func @transform_1(%arg0: i32, %arg1: i32) -> (i32, i32) {
    %c0_i32 = arith.constant 0 : i32
    %c0_i32_0 = arith.constant 0 : i32
    return %c0_i32, %arg1 : i32, i32
  }
  func.func @transform_2(%arg0: i32, %arg1: i32) -> (i32, i32) {
    %c0_i32 = arith.constant 0 : i32
    %c0_i32_0 = arith.constant 0 : i32
    return %c0_i32, %arg1 : i32, i32
  }
  func.func @transform_3(%arg0: i32, %arg1: i32) -> (i32, i32) {
    %c0_i32 = arith.constant 0 : i32
    return %arg0, %arg1 : i32, i32
  }
}

</mosaic_0001>

<bundles_post_ra>
// kernel: tpu_custom_call.1
= control target key start
LH: loop header
LB: loop body
LE: loop exit
PB: predicated region body
PF: predicated region fallthrough
CT: control target
= control target key end

     0   :  { %v170_v3 = vmov 0.0|0.0   ;;  %vm171_vm0 = vmmov 0   ;;  %v172_v6 = vmov 0.0   ;;  %s224_s0 = inlined_call_operand.vmem [shape: f32[8,32], index: 0, kind: input, shape index: {}]   ;;  %s225_s1 = inlined_call_operand.vmem [shape: f32[32,16], index: 1, kind: input, shape index: {}]   ;;  %s226_s2 = inlined_call_operand.vmem [shape: f32[1,16], index: 2, kind: input, shape index: {}]   ;;  %s227_s3 = inlined_call_operand.hbm [shape: f32[8,16], index: 3, kind: output, shape index: {}]  }
   0x1   :  { %v17_v0 = vld [vmem:[%s225_s1] sm:$0xff]  ;;  %v18_v1 = vld [vmem:[%s225_s1 + $0x8] sm:$0xff]  ;;  %v19_v2 = vld [vmem:[%s225_s1 + $0x10] sm:$0xff]  ;;  %136 = vmatprep.subr.bf16.mxu0 %v170_v3  ;;  %133 = vmatprep.mubr.msk.f32.mxu0 %vm171_vm0, %v172_v6 }
   0x2   :  { %v137_v4 = vpack.c.bf16 %v18_v1, %v17_v0  ;;  %v20_v5 = vld [vmem:[%s225_s1 + $0x18] sm:$0xff] }
   0x3   :  { %8 = vsyncpa [#allocation3], 0  ;;  %v140_v7 = vpack.c.bf16 %v20_v5, %v19_v2  ;;  %v16_v8 = vld [vmem:[%s224_s0] sm:$0xff]  ;;  %vm21_vm1 = vcmask 261120   ;;  %s173_s24 = smov [#allocation2]   ;;  %vm102_vm2 = vcmask 130048  }
   0x4   :  { %138 = vmatpush3.bf16.msra.mxu0 %v137_v4  ;;  %v119_v9 = vld [vmem:[%s226_s2] ss:$0 sm:$0xff]  ;;  %s110_s1 = sshll.u32 %s173_s24, 4  ;;  %s111_s1 = int_to_ptr.vmem [resolvable:$true] %s110_s1 }
   0x5   :  { %139 = vmatprep.subr.bf16.mxu0 %v170_v3  ;;  %s146_s25 = scalar_lea.vmem %s111_s1, 128  ;;  %p151_p1 = scmp.lt.s32.totalorder %s111_s1, %s111_s1 }
   0x6   :  { %p147_p0 = scmp.ne.s32.totalorder %s111_s1, %s146_s25  ;;  %p152_p2 = scmp.lt.s32.totalorder %s146_s25, %s146_s25 }
   0x8   :  { %141 = vmatpush3.bf16.msra.mxu0 %v140_v7  ;;  %p153_p3 = por %p152_p2, %p151_p1 }
   0xa   :  { %p154_p4 = pnand %p153_p3, %p147_p0 }
   0xb   :  { %134 = vmatmul.mubr.msk.f32.vlgmr.msra.gmra.mrb[0].mxu0 %vm21_vm1, %v16_v8 }
  0xde   :  { %v91_v10 = vpop.f32.mrb[0].mxu0 }
  0xdf   :  { %v101_v11 = vadd.f32 %v119_v9, %v91_v10  ;;  %v135_v12 = vpop.f32.mrb[1].mxu0 }
  0xe1   :  { %103 = vst.msk [vmem:[#allocation2] sm:$0xff] %vm102_vm2, %v101_v11 }
  0xe2   :  { %157 = shalt.err (!%p154_p4)
}
  0xe3   :  { %s158_s27 = scalar_lea.hbm %s227_s3, 128 }
  0xe4   :  { %p159_p5 = scmp.ne.s32.totalorder %s227_s3, %s158_s27  ;;  %p162_p6 = scmp.lt.u32.totalorder %s158_s27, %s227_s3 }
  0xe6   :  { %p164_p7 = pnand %p162_p6, %p159_p5 }
  0xe8   :  { %167 = shalt.err (!%p164_p7)
}
  0xe9   :  { %113 = dma.vmem_to_hbm [thread:$0]  %s111_s1, 128, %s227_s3, [#allocation3]  }
  0xea   :  { %168 = dma.done.wait [#allocation3], 128  }
  0xeb   :  { %169 = vsyncadd [#allocation3], 4294967168 }
  0xec   :  { %117 = vsyncpa [#allocation3], 1 }

</bundles_post_ra>
